<compile_context>
chip_gen: v5e
topology: v5e:2x2
jax: 0.10.0
libtpu: 0.0.40
codegen_flags: <defaults>
</compile_context>

<pallas_src>
import jax
import jax.numpy as jnp
from jax.experimental import pallas as pl
from jax.experimental.pallas import tpu as pltpu


# --------------------------------------------------------------------------------------
# Planning helpers
# --------------------------------------------------------------------------------------

def _round_up(x, m):
    return ((x + m - 1) // m) * m


def _vmem_capacity_bytes():
    """Physical per-core VMEM, with a conservative (v7x = 64 MiB) fallback."""
    try:
        cap = int(getattr(pltpu.get_tpu_info(), "vmem_capacity_bytes", 0))
        if cap > 0:
            return min(max(cap, 32 * 1024 * 1024), 256 * 1024 * 1024)
    except Exception:
        pass
    return 64 * 1024 * 1024


def _round_tile(tile, m_align):
    """Round a row tile down, preferring 256-/128-multiples (MXU cadence) over the bare align."""
    for g in (256, 128):
        if g % m_align == 0 and tile >= 2 * g:
            return (tile // g) * g
    return max(m_align, (tile // m_align) * m_align)


def _plan_tiles(cin, hidden, cout, itemsize, *, m_total, m_align, budget):
    """Pick (tile_m, h_chunk): rows (or lane columns) per grid step and hidden cols per k step."""

    def per_row(hc):
        # double-buffered x/out rows + f32 acc + f32 y temp + f32 h + its compute-dtype copy
        return 2 * (cin + cout) * itemsize + 2 * cout * 4 + hc * (4 + itemsize)

    full_m = m_total <= m_align          # one block spanning the whole row axis
    m_cap = m_total if full_m else _round_up(min(m_total, 2048), m_align)

    # Path 1: full hidden resident; weights/biases single-buffered (Buffered(1)).
    avail = budget - ((cin + cout) * hidden * itemsize + hidden * 4 + cout * 4)
    if avail > 0:
        tile = min(m_cap, avail // per_row(hidden))
        if tile >= m_cap:
            return int(m_cap), int(hidden)
        if (not full_m) and tile >= 256:
            return int(_round_tile(tile, m_align)), int(hidden)

    # Path 2: tile the hidden dimension (128-multiple chunks, double-buffered weight slabs).
    if full_m:
        candidates = [m_cap]
    else:
        candidates = [m for m in (1024, 512, 256, 128, 64, 32, 16, 8)
                      if m % m_align == 0 and m <= m_cap] or [m_align]
    for tile in candidates:
        num = budget - tile * per_row(0) - cout * 4
        den = 2 * ((cin + cout) * itemsize + 4) + tile * (4 + itemsize)
        hc = num // den if num > 0 else 0
        if hc >= 128:
            return int(tile), int(min(hidden, (hc // 128) * 128))

    # Fallback: smallest legal tiles; rely on vmem_limit headroom.
    return int(m_cap if full_m else m_align), int(min(hidden, 128))


def _fit_h_chunk(hidden, h_chunk):
    """Return (chunk, padded_hidden): chunk == hidden (no split) or a 128-multiple that either
    divides `hidden` or tiles a zero-padded hidden dimension."""
    if h_chunk >= hidden:
        return hidden, hidden
    h_chunk = max(128, (h_chunk // 128) * 128)
    for c in range(h_chunk, 127, -128):
        if hidden % c == 0:
            return c, hidden
    return h_chunk, _round_up(hidden, h_chunk)


def _maybe_buffered(shape, index_map, single):
    """Single-buffer blocks whose index map is constant over the whole grid."""
    if single:
        return pl.BlockSpec(shape, index_map, pipeline_mode=pl.Buffered(1))
    return pl.BlockSpec(shape, index_map)


# --------------------------------------------------------------------------------------
# Kernels
# --------------------------------------------------------------------------------------

def _ffn_nlc_kernel(x_ref, w1_ref, b1_ref, w2_ref, b2_ref, o_ref, acc_ref):
    # x: (TM, Cin)   w1: (Cin, Hc)   b1: (1, Hc) f32
    # w2: (Hc, Cout) b2: (1, Cout) f32
    # o: (TM, Cout)  acc: (TM, Cout) f32 scratch
    k = pl.program_id(1)

    @pl.when(k == 0)
    def _():
        acc_ref[...] = jnp.zeros_like(acc_ref)

    h = jnp.dot(x_ref[...], w1_ref[...], preferred_element_type=jnp.float32)   # MXU, f32 acc
    h = jnp.maximum(h + b1_ref[...], 0.0)                                      # bias + ReLU (f32)
    acc_ref[...] += jnp.dot(h.astype(w2_ref.dtype), w2_ref[...],
                            preferred_element_type=jnp.float32)                # MXU, f32 acc

    @pl.when(k == pl.num_programs(1) - 1)
    def _():
        o_ref[...] = (acc_ref[...] + b2_ref[...]).astype(o_ref.dtype)


def _ffn_ncl_kernel(x_ref, w1_ref, b1_ref, w2_ref, b2_ref, o_ref, acc_ref):
    # x: (1, Cin, TL)  w1: (Hc, Cin)  b1: (Hc, 1) f32
    # w2: (Cout, Hc)   b2: (Cout, 1) f32
    # o: (1, Cout, TL) acc: (Cout, TL) f32 scratch
    k = pl.program_id(2)

    @pl.when(k == 0)
    def _():
        acc_ref[...] = jnp.zeros_like(acc_ref)

    h = jax.lax.dot_general(w1_ref[...], x_ref[0], (((1,), (0,)), ((), ())),
                            preferred_element_type=jnp.float32)                # (Hc, TL)
    h = jnp.maximum(h + b1_ref[...], 0.0)
    acc_ref[...] += jax.lax.dot_general(w2_ref[...], h.astype(w2_ref.dtype),
                                        (((1,), (0,)), ((), ())),
                                        preferred_element_type=jnp.float32)    # (Cout, TL)

    @pl.when(k == pl.num_programs(2) - 1)
    def _():
        o_ref[0] = (acc_ref[...] + b2_ref[...]).astype(o_ref.dtype)


# --------------------------------------------------------------------------------------
# Wrappers
# --------------------------------------------------------------------------------------

def ffn_block_nlc(x_nlc, w1m, b1, w2m, b2, *, tile_m=None, h_chunk=None):
    """Channels-last FFN: x (B, L, Cin) -> (B, L, Cout).
    w1m: (Cin, H); b1: (H,); w2m: (H, Cout); b2: (Cout,). Compute dtype follows x."""
    B, L, Cin = x_nlc.shape
    H = w1m.shape[1]
    Cout = w2m.shape[1]
    cdt = x_nlc.dtype
    isz = jnp.dtype(cdt).itemsize

    cap = _vmem_capacity_bytes()
    budget = int(cap * 0.72)
    vmem_limit = int(cap * 0.90)

    M = B * L
    m_align = 16 if isz == 2 else 8
    if tile_m is None or h_chunk is None:
        tm, hc = _plan_tiles(Cin, H, Cout, isz, m_total=M, m_align=m_align, budget=budget)
        tile_m = int(tile_m or tm)
        h_chunk = int(h_chunk or hc)
    h_chunk, H_pad = _fit_h_chunk(H, h_chunk)

    x2 = x_nlc.reshape(M, Cin)                       # free: row-major contiguous
    w1m = w1m.astype(cdt)
    w2m = w2m.astype(cdt)
    b1m = b1.reshape(1, H).astype(jnp.float32)
    b2m = b2.reshape(1, Cout).astype(jnp.float32)
    if H_pad != H:                                   # zero-pad hidden so chunks tile it exactly
        w1m = jnp.pad(w1m, ((0, 0), (0, H_pad - H)))
        b1m = jnp.pad(b1m, ((0, 0), (0, H_pad - H)))
        w2m = jnp.pad(w2m, ((0, H_pad - H), (0, 0)))

    n_m = pl.cdiv(M, tile_m)
    n_h = H_pad // h_chunk
    single = (n_h == 1)                              # weight index maps constant over the grid

    cost = pl.CostEstimate(
        flops=2 * M * (Cin * H_pad + H_pad * Cout),
        transcendentals=0,
        bytes_accessed=(M * (Cin + Cout) * isz
                        + (1 if single else n_m) * ((Cin + Cout) * H_pad * isz + H_pad * 4)
                        + Cout * 4),
    )

    out = pl.pallas_call(
        _ffn_nlc_kernel,
        out_shape=jax.ShapeDtypeStruct((M, Cout), cdt),
        grid_spec=pltpu.PrefetchScalarGridSpec(
            num_scalar_prefetch=0,
            grid=(n_m, n_h),
            in_specs=[
                pl.BlockSpec((tile_m, Cin), lambda m, k: (m, 0)),
                _maybe_buffered((Cin, h_chunk), lambda m, k: (0, k), single),
                _maybe_buffered((1, h_chunk), lambda m, k: (0, k), single),
                _maybe_buffered((h_chunk, Cout), lambda m, k: (k, 0), single),
                _maybe_buffered((1, Cout), lambda m, k: (0, 0), True),
            ],
            out_specs=pl.BlockSpec((tile_m, Cout), lambda m, k: (m, 0)),
            scratch_shapes=[pltpu.VMEM((tile_m, Cout), jnp.float32)],
        ),
        compiler_params=pltpu.CompilerParams(
            dimension_semantics=("parallel", "arbitrary"),
            vmem_limit_bytes=vmem_limit),
        cost_estimate=cost,
    )(x2, w1m, b1m, w2m, b2m)

    return out.reshape(B, L, Cout)


def ffn_block_ncl(x_ncl, w1c, b1, w2c, b2, *, tile_l=None, h_chunk=None):
    """Channels-first (PyTorch NCL) native FFN: x (B, Cin, L) -> (B, Cout, L); L rides the lanes.
    w1c: (H, Cin) = fc1.weight[:, :, 0]; w2c: (Cout, H) = fc2.weight[:, :, 0]."""
    B, Cin, L = x_ncl.shape
    H = w1c.shape[0]
    Cout = w2c.shape[0]
    cdt = x_ncl.dtype
    isz = jnp.dtype(cdt).itemsize

    cap = _vmem_capacity_bytes()
    budget = int(cap * 0.72)
    vmem_limit = int(cap * 0.90)

    if tile_l is None or h_chunk is None:
        tl, hc = _plan_tiles(Cin, H, Cout, isz, m_total=L, m_align=128, budget=budget)
        tile_l = int(tile_l or tl)
        h_chunk = int(h_chunk or hc)
    h_chunk, H_pad = _fit_h_chunk(H, h_chunk)

    w1c = w1c.astype(cdt)
    w2c = w2c.astype(cdt)
    b1m = b1.reshape(H, 1).astype(jnp.float32)
    b2m = b2.reshape(Cout, 1).astype(jnp.float32)
    if H_pad != H:
        w1c = jnp.pad(w1c, ((0, H_pad - H), (0, 0)))
        b1m = jnp.pad(b1m, ((0, H_pad - H), (0, 0)))
        w2c = jnp.pad(w2c, ((0, 0), (0, H_pad - H)))

    n_l = pl.cdiv(L, tile_l)
    n_h = H_pad // h_chunk
    single = (n_h == 1)

    cost = pl.CostEstimate(
        flops=2 * B * L * (Cin * H_pad + H_pad * Cout),
        transcendentals=0,
        bytes_accessed=(B * L * (Cin + Cout) * isz
                        + (1 if single else B * n_l) * ((Cin + Cout) * H_pad * isz + H_pad * 4)
                        + Cout * 4),
    )

    return pl.pallas_call(
        _ffn_ncl_kernel,
        out_shape=jax.ShapeDtypeStruct((B, Cout, L), cdt),
        grid_spec=pltpu.PrefetchScalarGridSpec(
            num_scalar_prefetch=0,
            grid=(n_l, B, n_h),                       # largest parallel extent first (megacore)
            in_specs=[
                pl.BlockSpec((1, Cin, tile_l), lambda l, b, k: (b, 0, l)),
                _maybe_buffered((h_chunk, Cin), lambda l, b, k: (k, 0), single),
                _maybe_buffered((h_chunk, 1), lambda l, b, k: (k, 0), single),
                _maybe_buffered((Cout, h_chunk), lambda l, b, k: (0, k), single),
                _maybe_buffered((Cout, 1), lambda l, b, k: (0, 0), True),
            ],
            out_specs=pl.BlockSpec((1, Cout, tile_l), lambda l, b, k: (b, 0, l)),
            scratch_shapes=[pltpu.VMEM((Cout, tile_l), jnp.float32)],
        ),
        compiler_params=pltpu.CompilerParams(
            dimension_semantics=("parallel", "parallel", "arbitrary"),
            vmem_limit_bytes=vmem_limit),
        cost_estimate=cost,
    )(x_ncl, w1c, b1m, w2c, b2m)


def ffn_block(x_ncl, w1, b1, w2, b2, **kw):
    """PyTorch Conv1d layout parity: x (B, Cin, L); w1 (H, Cin, 1); b1 (H,); w2 (Cout, H, 1);
    b2 (Cout,). Uses the channels-first-native kernel: no activation transposes in HBM."""
    return ffn_block_ncl(x_ncl, w1[:, :, 0], b1, w2[:, :, 0], b2, **kw)


def _reference(x_ncl, w1, b1, w2, b2):
    # Pure-JAX reference of the PyTorch forward (eval mode, drop=0), f32 precision.
    hp = jax.lax.Precision.HIGHEST
    h = jnp.einsum("bcl,hc->bhl", x_ncl, w1[:, :, 0], precision=hp) + b1[None, :, None]
    h = jnp.maximum(h, 0.0)
    return jnp.einsum("bhl,oh->bol", h, w2[:, :, 0], precision=hp) + b2[None, :, None]


# --------------------------------------------------------------------------------------
# Self-test
# --------------------------------------------------------------------------------------

if __name__ == "__main__":
    key = jax.random.PRNGKey(0)

    # Small config matching the module defaults (out_features = in_features).
    B, Cin, L = 2, 8, 16
    hidden = 32
    Cout = Cin
    k1, k2, k3, k4, k5 = jax.random.split(key, 5)
    x = jax.random.normal(k1, (B, Cin, L), dtype=jnp.float32)
    w1 = jax.random.normal(k2, (hidden, Cin, 1), dtype=jnp.float32) * 0.1   # Conv1d weight (H, Cin, 1)
    b1 = jax.random.normal(k3, (hidden,), dtype=jnp.float32) * 0.1
    w2 = jax.random.normal(k4, (Cout, hidden, 1), dtype=jnp.float32) * 0.1
    b2 = jax.random.normal(k5, (Cout,), dtype=jnp.float32) * 0.1
    ref = _reference(x, w1, b1, w2, b2)

    # 1) PyTorch-layout entry point: channels-first native kernel.
    out = jax.block_until_ready(ffn_block(x, w1, b1, w2, b2))
    assert out.shape == (B, Cout, L), out.shape
    assert jnp.allclose(out, ref, atol=1e-3, rtol=1e-3), "NCL f32 mismatch vs reference"

    # 2) Channels-last entry point (flattened-rows kernel).
    x_nlc = jnp.transpose(x, (0, 2, 1))
    w1m = jnp.transpose(w1[:, :, 0], (1, 0))
    w2m = jnp.transpose(w2[:, :, 0], (1, 0))
    out_nlc = jax.block_until_ready(ffn_block_nlc(x_nlc, w1m, b1, w2m, b2))
    assert jnp.allclose(jnp.transpose(out_nlc, (0, 2, 1)), ref,
                        atol=1e-3, rtol=1e-3), "NLC f32 mismatch vs reference"

    # 3) bf16 MXU path (f32 accumulation) — loose tolerance vs f32 reference.
    out_bf16 = jax.block_until_ready(
        ffn_block_nlc(x_nlc.astype(jnp.bfloat16), w1m, b1, w2m, b2))
    assert out_bf16.dtype == jnp.bfloat16
    assert jnp.allclose(jnp.transpose(out_bf16.astype(jnp.float32), (0, 2, 1)), ref,
                        atol=5e-2, rtol=5e-2), "NLC bf16 mismatch vs reference"

    # 4) Hidden-tiled accumulator path (n_h > 1), both layouts, modest shapes.
    B2, Cin2, L2, H2, Cout2 = 1, 128, 256, 256, 128
    j1, j2, j3, j4, j5 = jax.random.split(jax.random.PRNGKey(1), 5)
    x2 = jax.random.normal(j1, (B2, Cin2, L2), dtype=jnp.float32) * 0.1
    w1b = jax.random.normal(j2, (H2, Cin2, 1), dtype=jnp.float32) * 0.05
    b1b = jax.random.normal(j3, (H2,), dtype=jnp.float32) * 0.05
    w2b = jax.random.normal(j4, (Cout2, H2, 1), dtype=jnp.float32) * 0.05
    b2b = jax.random.normal(j5, (Cout2,), dtype=jnp.float32) * 0.05
    ref2 = _reference(x2, w1b, b1b, w2b, b2b)

    out2 = jax.block_until_ready(
        ffn_block_ncl(x2, w1b[:, :, 0], b1b, w2b[:, :, 0], b2b, tile_l=128, h_chunk=128))
    assert jnp.allclose(out2, ref2, atol=1e-3, rtol=1e-3), "NCL H-tiled mismatch vs reference"

    out3 = jax.block_until_ready(
        ffn_block_nlc(jnp.transpose(x2, (0, 2, 1)),
                      jnp.transpose(w1b[:, :, 0], (1, 0)), b1b,
                      jnp.transpose(w2b[:, :, 0], (1, 0)), b2b,
                      tile_m=128, h_chunk=128))
    assert jnp.allclose(jnp.transpose(out3, (0, 2, 1)), ref2,
                        atol=1e-3, rtol=1e-3), "NLC H-tiled mismatch vs reference"

    print("KERNEL_OK")
</pallas_src>

<mosaic_0001>
module attributes {stable_mosaic.version = 11 : i64} {
  func.func @_ffn_ncl_kernel(%arg0: i32, %arg1: i32, %arg2: i32, %arg3: memref<1x8x16xf32, #tpu.memory_space<vmem>>, %arg4: memref<32x8xf32, #tpu.memory_space<vmem>>, %arg5: memref<32x1xf32, #tpu.memory_space<vmem>>, %arg6: memref<8x32xf32, #tpu.memory_space<vmem>>, %arg7: memref<8x1xf32, #tpu.memory_space<vmem>>, %arg8: memref<1x8x16xf32, #tpu.memory_space<vmem>>, %arg9: memref<8x16xf32, #tpu.memory_space<vmem>>) attributes {dimension_semantics = [#tpu.dimension_semantics<parallel>, #tpu.dimension_semantics<parallel>, #tpu.dimension_semantics<arbitrary>], iteration_bounds = array<i64: 1, 2, 1>, scalar_prefetch = 0 : i64, scratch_operands = 1 : i64, tpu.core_type = #tpu.core_type<tc>, window_params = [{transform_indices = @transform_0, window_bounds = array<i64: 1, 8, 16>}, {pipeline_mode = #tpu.pipeline_mode<synchronous>, transform_indices = @transform_1, window_bounds = array<i64: 32, 8>}, {pipeline_mode = #tpu.pipeline_mode<synchronous>, transform_indices = @transform_2, window_bounds = array<i64: 32, 1>}, {pipeline_mode = #tpu.pipeline_mode<synchronous>, transform_indices = @transform_3, window_bounds = array<i64: 8, 32>}, {pipeline_mode = #tpu.pipeline_mode<synchronous>, transform_indices = @transform_4, window_bounds = array<i64: 8, 1>}, {transform_indices = @transform_5, window_bounds = array<i64: 1, 8, 16>}]} {
    %c0_i32 = arith.constant 0 : i32
    %0 = arith.cmpi eq, %arg2, %c0_i32 : i32
    %1 = arith.extui %0 : i1 to i32
    %c0_i32_0 = arith.constant 0 : i32
    %2 = arith.cmpi ne, %1, %c0_i32_0 : i32
    scf.if %2 {
      %cst_17 = arith.constant 0.000000e+00 : f32
      %20 = vector.broadcast %cst_17 : f32 to vector<8x16xf32>
      %c0_18 = arith.constant 0 : index
      %c0_19 = arith.constant 0 : index
      %21 = vector.load %arg9[%c0_18, %c0_19] : memref<8x16xf32, #tpu.memory_space<vmem>>, vector<8x16xf32>
      tpu.vector_store %arg9[%c0_18, %c0_19], %20 {strides = array<i32>} : memref<8x16xf32, #tpu.memory_space<vmem>>, vector<8x16xf32>,
    } else {
    }
    %c0 = arith.constant 0 : index
    %c0_1 = arith.constant 0 : index
    %3 = vector.load %arg4[%c0, %c0_1] : memref<32x8xf32, #tpu.memory_space<vmem>>, vector<32x8xf32>
    %c0_2 = arith.constant 0 : index
    %c0_3 = arith.constant 0 : index
    %c0_4 = arith.constant 0 : index
    %4 = vector.load %arg3[%c0_2, %c0_3, %c0_4] : memref<1x8x16xf32, #tpu.memory_space<vmem>>, vector<1x8x16xf32>
    %5 = vector.shape_cast %4 : vector<1x8x16xf32> to vector<8x16xf32>
    %cst = arith.constant dense<0.000000e+00> : vector<32x16xf32>
    %6 = tpu.matmul %3, %5, %cst {dimension_numbers = #tpu.dot_dimension_numbers<[1], [0], [0], [1], [0, 0, 1, 1], [], []>} : vector<32x8xf32>, vector<8x16xf32>, vector<32x16xf32> -> vector<32x16xf32>
    %c0_5 = arith.constant 0 : index
    %c0_6 = arith.constant 0 : index
    %7 = vector.load %arg5[%c0_5, %c0_6] : memref<32x1xf32, #tpu.memory_space<vmem>>, vector<32x1xf32>
    %8 = vector.broadcast %7 : vector<32x1xf32> to vector<32x16xf32>
    %9 = arith.addf %6, %8 : vector<32x16xf32>
    %cst_7 = arith.constant 0.000000e+00 : f32
    %10 = vector.broadcast %cst_7 : f32 to vector<32x16xf32>
    %11 = arith.maximumf %9, %10 : vector<32x16xf32>
    %c0_8 = arith.constant 0 : index
    %c0_9 = arith.constant 0 : index
    %12 = vector.load %arg9[%c0_8, %c0_9] : memref<8x16xf32, #tpu.memory_space<vmem>>, vector<8x16xf32>
    %c0_10 = arith.constant 0 : index
    %c0_11 = arith.constant 0 : index
    %13 = vector.load %arg6[%c0_10, %c0_11] : memref<8x32xf32, #tpu.memory_space<vmem>>, vector<8x32xf32>
    %cst_12 = arith.constant dense<0.000000e+00> : vector<8x16xf32>
    %14 = tpu.matmul %13, %11, %cst_12 {dimension_numbers = #tpu.dot_dimension_numbers<[1], [0], [0], [1], [0, 0, 1, 1], [], []>} : vector<8x32xf32>, vector<32x16xf32>, vector<8x16xf32> -> vector<8x16xf32>
    %15 = arith.addf %12, %14 : vector<8x16xf32>
    %c0_13 = arith.constant 0 : index
    %c0_14 = arith.constant 0 : index
    %16 = vector.load %arg9[%c0_13, %c0_14] : memref<8x16xf32, #tpu.memory_space<vmem>>, vector<8x16xf32>
    tpu.vector_store %arg9[%c0_13, %c0_14], %15 {strides = array<i32>} : memref<8x16xf32, #tpu.memory_space<vmem>>, vector<8x16xf32>,
    %c0_i32_15 = arith.constant 0 : i32
    %17 = arith.cmpi eq, %arg2, %c0_i32_15 : i32
    %18 = arith.extui %17 : i1 to i32
    %c0_i32_16 = arith.constant 0 : i32
    %19 = arith.cmpi ne, %18, %c0_i32_16 : i32
    scf.if %19 {
      %c0_17 = arith.constant 0 : index
      %c0_18 = arith.constant 0 : index
      %20 = vector.load %arg9[%c0_17, %c0_18] : memref<8x16xf32, #tpu.memory_space<vmem>>, vector<8x16xf32>
      %c0_19 = arith.constant 0 : index
      %c0_20 = arith.constant 0 : index
      %21 = vector.load %arg7[%c0_19, %c0_20] : memref<8x1xf32, #tpu.memory_space<vmem>>, vector<8x1xf32>
      %22 = vector.broadcast %21 : vector<8x1xf32> to vector<8x16xf32>
      %23 = arith.addf %20, %22 : vector<8x16xf32>
      %c0_21 = arith.constant 0 : index
      %c0_22 = arith.constant 0 : index
      %c0_23 = arith.constant 0 : index
      %24 = vector.load %arg8[%c0_21, %c0_22, %c0_23] : memref<1x8x16xf32, #tpu.memory_space<vmem>>, vector<1x8x16xf32>
      %25 = vector.shape_cast %24 : vector<1x8x16xf32> to vector<8x16xf32>
      %26 = vector.shape_cast %23 : vector<8x16xf32> to vector<1x8x16xf32>
      tpu.vector_store %arg8[%c0_21, %c0_22, %c0_23], %26 {strides = array<i32>} : memref<1x8x16xf32, #tpu.memory_space<vmem>>, vector<1x8x16xf32>,
    } else {
    }
    return
  }
  func.func @transform_0(%arg0: i32, %arg1: i32, %arg2: i32) -> (i32, i32, i32) {
    %c0_i32 = arith.constant 0 : i32
    %c0_i32_0 = arith.constant 0 : i32
    return %arg1, %c0_i32, %arg0 : i32, i32, i32
  }
  func.func @transform_1(%arg0: i32, %arg1: i32, %arg2: i32) -> (i32, i32) {
    %c0_i32 = arith.constant 0 : i32
    %c0_i32_0 = arith.constant 0 : i32
    return %arg2, %c0_i32 : i32, i32
  }
  func.func @transform_2(%arg0: i32, %arg1: i32, %arg2: i32) -> (i32, i32) {
    %c0_i32 = arith.constant 0 : i32
    %c0_i32_0 = arith.constant 0 : i32
    return %arg2, %c0_i32 : i32, i32
  }
  func.func @transform_3(%arg0: i32, %arg1: i32, %arg2: i32) -> (i32, i32) {
    %c0_i32 = arith.constant 0 : i32
    %c0_i32_0 = arith.constant 0 : i32
    return %c0_i32, %arg2 : i32, i32
  }
  func.func @transform_4(%arg0: i32, %arg1: i32, %arg2: i32) -> (i32, i32) {
    %c0_i32 = arith.constant 0 : i32
    %c0_i32_0 = arith.constant 0 : i32
    %c0_i32_1 = arith.constant 0 : i32
    return %c0_i32, %c0_i32_0 : i32, i32
  }
  func.func @transform_5(%arg0: i32, %arg1: i32, %arg2: i32) -> (i32, i32, i32) {
    %c0_i32 = arith.constant 0 : i32
    %c0_i32_0 = arith.constant 0 : i32
    return %arg1, %c0_i32, %arg0 : i32, i32, i32
  }
}

</mosaic_0001>

<bundles_post_ra>
// kernel: tpu_custom_call.1
= control target key start
LH: loop header
LB: loop body
LE: loop exit
PB: predicated region body
PF: predicated region fallthrough
CT: control target
= control target key end

     0   :  { %10 = vsyncpa [#allocation4], 0  ;;  %s894_s0 = inlined_call_operand.vmem [shape: f32[2,8,16], index: 0, kind: input, shape index: {}]   ;;  %s895_s1 = inlined_call_operand.vmem [shape: f32[32,8], index: 1, kind: input, shape index: {}]   ;;  %s896_s2 = inlined_call_operand.vmem [shape: f32[32,1], index: 2, kind: input, shape index: {}]   ;;  %s897_s3 = inlined_call_operand.vmem [shape: f32[8,32], index: 3, kind: input, shape index: {}]   ;;  %s898_s4 = inlined_call_operand.vmem [shape: f32[8,1], index: 4, kind: input, shape index: {}]   ;;  %s899_s5 = inlined_call_operand.hbm [shape: f32[2,8,16], index: 5, kind: output, shape index: {}]  }
   0x1   :  { %12 = vsyncpa [#allocation4 + $0x1], 0  ;;  %s764_s18 = smov 0   ;;  %s766_s19 = smov 0  }
   0x2   :  { %s768_s20 = smov 0   ;;  %s770_s21 = smov 0  }
   0x3   :  { %s772_s22 = smov 0   ;;  %s774_s23 = smov 0  }
   0x4 LB: > { %s571_s24 = sadd.s32 4294967295, %s730_s23   ;;  %s572_s25 = sadd.s32 4294967294, %s730_s23   ;;  %s730_s23 = sphi %s774_s23, %s18_s23   ;;  %s726_s22 = sphi %s772_s22, %s906_s22   ;;  %s722_s21 = sphi %s770_s21, %s905_s21   ;;  %s718_s20 = sphi %s768_s20, %s904_s20   ;;  %s714_s19 = sphi %s766_s19, %s903_s19   ;;  %s710_s18 = sphi %s764_s18, %s902_s18  }
   0x5   : > { %s33_s26 = sadd.s32 1, %s726_s22  ;;  %s173_s27 = sadd.s32 1, %s718_s20 }
   0x6   : > { %p35_p0 = scmp.ge.s32.totalorder %s33_s26, 2  ;;  %p183_p1 = scmp.ne.s32.totalorder %s718_s20, %s714_s19 }
   0x7   : > { %p184_p2 = scmp.eq.s32.totalorder %s571_s24, 1  ;;  %p189_p3 = scmp.ne.s32.totalorder %s714_s19, %s710_s18 }
   0x8   : > { %s908_s26 = smov (%p35_p0, %s33_s26), 0  ;;  %p190_p5 = scmp.eq.s32.totalorder %s572_s25, 1 }
   0x9   : > { %p804_p4 = por %p184_p2, %p183_p1  ;;  %s168_s29 = ssub.s32 %s726_s22, %s908_s26 }
   0xa   : > { %p578_p6 = scmp.ge.s32.totalorder %s730_s23, 1  ;;  %p171_p7 = scmp.eq.s32.totalorder %s168_s29, 0 }
   0xb   : > { %p811_p8 = por %p190_p5, %p189_p3  ;;  %p246_p9 = scmp.lt.s32.totalorder %s730_s23, 3 }
   0xc   : > { %s817_s6 = scalar_select %p171_p7, %s718_s20, %s173_s27  }
   0xd   : > { %p247_p10 = pnand %p578_p6, %p246_p9 }
   0xe   : > { %p290_p11 = scmp.lt.s32.totalorder (!%p247_p10), %s722_s21, 1  ;;  %s287_s17 = sand.u32 (!%p247_p10), 1, %s714_s19  }
   0xf   : > { %250 = sbr.rel (%p247_p10) target bundleno = 316 (0x13c), region = 40  ;;  %s579_s24 = sshll.u32 (!%p247_p10), %s287_s17, 3 }
  0x10   : > { %s587_s25 = sshll.u32 (!%p247_p10), %s722_s21, 3  ;;  %s289_s8 = scalar_lea.vmem (!%p247_p10), [#allocation3], %s579_s24 }
  0x11   : > { %s447_s7 = scalar_lea.hbm (!%p247_p10), %s899_s5, %s587_s25  ;;  %s449_s9 = sshll.u32 (!%p247_p10), %s289_s8, 4  ;;  %s450_s9 = int_to_ptr.vmem [resolvable:$true] %s449_s9 }
  0x12   : > { %s451_s10 = sshll.u32 (!%p247_p10), %s447_s7, 4  ;;  %s452_s10 = int_to_ptr.hbm [resolvable:$true] %s451_s10 }
  0x14   : > { %v732_v0 = vmov 0   ;;  %v327_v1 = vld [vmem:[%s896_s2 + $0x18] sm:$0xff]  ;;  %v325_v2 = vld [vmem:[%s896_s2 + $0x8] sm:$0xff]  ;;  %s291_s11 = scalar_select %p290_p11, %s722_s21, 1  ;;  %vm348_vm0 = vcmask 64512   ;;  %v319_v6 = vld [vmem:[%s895_s1] sm:$0xff] }
  0x15   : > { %649 = vset.pattern.permute.xlu0 %v732_v0  ;;  %650 = vset.pattern.permute.xlu1 %v732_v0  ;;  %v320_v3 = vld [vmem:[%s895_s1 + $0x8] sm:$0xff]  ;;  %v322_v4 = vld [vmem:[%s895_s1 + $0x18] sm:$0xff]  ;;  %v326_v7 = vld [vmem:[%s896_s2 + $0x10] sm:$0xff]  ;;  %vm317_vm1 = vcmask 130048   ;;  %v733_v11 = vmov 0.0   ;;  %vm396_vm2 = vcmask 261120  }
  0x16   : > { %345 = vperm.xlu0 %649, %v327_v1   ;;  %335 = vperm.xlu1 %650, %v325_v2   ;;  %s580_s12 = sshll.u32 %s291_s11, 3  ;;  %v324_v8 = vld [vmem:[%s896_s2] sm:$0xff]  ;;  %v321_v9 = vld [vmem:[%s895_s1 + $0x10] sm:$0xff]  ;;  %318 = vst.msk [vmem:[#allocation2] sm:$0xff] %vm317_vm1, %v733_v11  ;;  %s436_s11 = scalar_lea.sflag [#allocation4], %s287_s17 }
  0x17   : > { %651 = vset.pattern.permute.xlu2 %v732_v0  ;;  %s296_s15 = scalar_lea.vmem %s894_s0, %s580_s12  ;;  %v427_v10 = vld [vmem:[%s898_s4] sm:$0xff]  ;;  %s666_s12 = sshra.s32 %s452_s10, 4  ;;  %s667_s12 = int_to_ptr.hbm [resolvable:$true] %s666_s12 }
  0x18   : > { %v323_v5 = vld [vmem:[%s296_s15] sm:$0xff]  ;;  %430 = vperm.xlu2 %651, %v427_v10   ;;  %s668_s21 = scalar_lea.hbm %s667_s12, 8  ;;  %s672_s15 = scalar_lea.hbm %s899_s5, 16 }
  0x19   : > { %590 = vmatpush.msra.mxu2 %v323_v5  ;;  %591 = vmatpush.msra.mxu3 %v323_v5  ;;  %v395_v28 = vld [vmem:[%s897_s3] sm:$0xff]  ;;  %p669_p12 = scmp.ne.s32.totalorder %s667_s12, %s668_s21  ;;  %p673_p1 = scmp.lt.s32.totalorder %s667_s12, %s899_s5 }
  0x1a   : > { %582 = vmatmul.msk.f32.vlgmr.msra.gmra.mxu2 %vm348_vm0, %v320_v3  ;;  %584 = vmatmul.msk.f32.vlgmr.msra.gmra.mxu3 %vm348_vm0, %v322_v4  ;;  %p674_p2 = scmp.lt.s32.totalorder %s672_s15, %s668_s21 }
  0x1b   : > { %376 = vmatpush.msra.mxu0 %v323_v5  ;;  %p670_p13 = pnand %p669_p12, %p804_p4 }
  0x1c   : > { %581 = vmatmul.msk.f32.vlgmr.msra.gmra.mxu0 %vm348_vm0, %v319_v6  ;;  %p675_p3 = por %p674_p2, %p673_p1 }
  0x1d   : > { %v394_v29 = vld [vmem:[#allocation2] sm:$0xff]  ;;  %p671_p0 = pneg %p670_p13 }
  0x1e   : > { %340 = vperm.xlu0 %649, %v326_v7   ;;  %330 = vperm.xlu1 %650, %v324_v8  }
  0x1f   : > { %p676_p5 = pnand %p675_p3, %p671_p0 }
  0x22   : > { %583 = vmatmul.msk.f32.gmra.mxu2 %vm348_vm0, %v321_v9 }
  0x72   : > { %v431_v32 = vpop.permute.xlu2 %430 }
  0x88   : > { %v346_v12 = vpop.permute.xlu0 %345  ;;  %v336_v13 = vpop.permute.xlu1 %335 }
  0x90   : > { %v341_v18 = vpop.permute.xlu0 %340  ;;  %v331_v19 = vpop.permute.xlu1 %330 }
  0x99   : > { %v378_v20 = vpop.f32.mrf.mxu0 }
  0x9a   : > { %v379_v24 = vadd.f32 %v378_v20, %v331_v19 }
  0x9c   : > { %v390_v27 = vmax.f32 %v379_v24, 0.0 }
  0x9d   : > { %v381_v14 = vpop.f32.mrf.mxu2  ;;  %v387_v15 = vpop.f32.mrf.mxu3 }
  0x9e   : > { %v388_v16 = vadd.f32 %v387_v15, %v346_v12  ;;  %v382_v22 = vadd.f32 %v381_v14, %v336_v13 }
  0xa0   : > { %v393_v17 = vmax.f32 %v388_v16, 0.0  ;;  %v391_v26 = vmax.f32 %v382_v22, 0.0 }
  0xa2   : > { %412 = vmatpush.msra.mxu1 %v393_v17 }
  0xa5   : > { %v384_v21 = vpop.f32.mrf.mxu2 }
  0xa6   : > { %v385_v23 = vadd.f32 %v384_v21, %v341_v18 }
  0xa8   : > { %v392_v25 = vmax.f32 %v385_v23, 0.0 }
  0xaa   : > { %413 = vmatpush.msra.mxu1 %v392_v25 }
  0xac   : > { %414 = vmatpush.msra.mxu1 %v391_v26 }
  0xae   : > { %415 = vmatpush.msra.mxu1 %v390_v27 }
  0xaf   : > { %585 = vmatmul.msk.f32.vlgmr.msra.gmra.mxu1 %vm396_vm2, %v395_v28 }
 0x12c   : > { %v417_v30 = vpop.f32.mrf.mxu1 }
 0x12d   : > { %v420_v31 = vadd.f32 %v417_v30, %v394_v29 }
 0x12f   : > { %422 = vst.msk [vmem:[#allocation2] sm:$0xff] %vm317_vm1, %v420_v31 }
 0x136   : > { %v426_v33 = vld [vmem:[#allocation2] sm:$0xff] }
 0x137   : > { %v433_v34 = vadd.f32 %v431_v32, %v426_v33 }
 0x139   : > { %434 = vst.msk [vmem:[%s289_s8] sm:$0xff] %vm317_vm1, %v433_v34 }
 0x13a   : > { %679 = shalt.err (!%p676_p5)
}
 0x13b   : > { %592 = dma.vmem_to_hbm [thread:$0]  (%p804_p4), %s450_s9, 128, %s452_s10, %s436_s11  }
 0x13c PF: > { %p598_p6 = scmp.ge.s32.totalorder %s730_s23, 2  ;;  %s463_s17 = sand.u32 1, %s710_s18  }
 0x13d   : > { %s464_s25 = scalar_lea.sflag [#allocation4], %s463_s17 }
 0x13e   : > { %p595_p7 = pnand %p598_p6, %p811_p8 }
 0x140   : > { %p596_p9 = pneg %p595_p7 }
 0x142   : > { %705 = dma.done.wait (%p596_p9), %s464_s25, 128  }
 0x143   : > { %707 = vsyncadd (%p596_p9), %s464_s25, 4294967168  ;;  %s18_s23 = sadd.s32 1, %s730_s23   ;;  %s902_s18 = smov %s714_s19 }
 0x144   : > { %p15_p10 = scmp.ge.s32.totalorder %s18_s23, 4   ;;  %s903_s19 = smov %s718_s20 }
 0x145   : > { %s904_s20 = smov %s817_s6  ;;  %s905_s21 = smov %s726_s22 }
 0x146   : > { %s906_s22 = smov %s908_s26  ;;  %17 = sbr.rel (!%p15_p10) target bundleno = 4 (0x4), region = 92 }
 0x14b   :  { %470 = vsyncpa [#allocation4], 1 }
 0x14c   :  { %472 = vsyncpa [#allocation4 + $0x1], 1 }

</bundles_post_ra>
